<compile_context>
chip_gen: v7x
topology: tpu7x:2x2x1
jax: 0.10.0
libtpu: 0.0.40
codegen_flags: <defaults>
</compile_context>

<pallas_src>
import jax
import jax.numpy as jnp
from jax.experimental import pallas as pl
from jax.experimental.pallas import tpu as pltpu

EPS = 1e-5  # PyTorch BatchNorm2d default


def basic_block_kernel(xp_ref, wb1_ref, wb2_ref, s_ref, st_ref,
                       g1_ref, b1_ref, g2_ref, b2_ref, o_ref):
    # xp_ref : (N, H+2, (W+2)*C) f32  zero-padded input, (w, c) packed into lanes
    # wb*_ref: (9*W*C, W*C)     bf16  block-diagonal im2col conv weights
    # s_ref  : (W*C, C)         f32   sum-over-w selector (packed lanes -> channels)
    # st_ref : (C, W*C)         f32   channel -> packed-lane broadcast
    # g*/b*  : (1, C)           f32   BatchNorm affine params
    # o_ref  : (N*H, W*C)             packed output slab
    N, Hp, _ = xp_ref.shape
    WC, C = s_ref.shape
    H = Hp - 2
    W = WC // C
    NH = N * H
    inv_cnt = 1.0 / float(N * H * W)   # elements per channel for batch stats

    def conv_packed(taps, wb_ref):
        # im2col along the lane axis -> single bf16 MXU matmul, f32 accumulation.
        patches = jnp.concatenate(taps, axis=-1)                 # (NH, 9*WC) bf16
        return jnp.dot(patches, wb_ref[...],
                       preferred_element_type=jnp.float32)       # (NH, WC) f32

    def batchnorm_packed(acc, g_ref, b_ref):
        # Channel sums and sums-of-squares in one pass via ones-row MXU matmuls.
        ones_rows = jnp.ones((1, NH), jnp.float32)
        col = jnp.dot(ones_rows, jnp.concatenate([acc, acc * acc], axis=-1),
                      preferred_element_type=jnp.float32)        # (1, 2*WC)
        ch = jnp.dot(jnp.concatenate([col[:, :WC], col[:, WC:]], axis=0),
                     s_ref[...], preferred_element_type=jnp.float32)  # (2, C)
        mean_c = ch[0:1, :] * inv_cnt                            # (1, C)
        var_c = jnp.maximum(ch[1:2, :] * inv_cnt - mean_c * mean_c, 0.0)
        scale_c = g_ref[...] * jax.lax.rsqrt(var_c + EPS)        # (1, C)
        shift_c = b_ref[...] - mean_c * scale_c
        # broadcast per-channel scale/shift back to the packed (w, c) lane layout
        scale_p = jnp.dot(scale_c, st_ref[...], preferred_element_type=jnp.float32)
        shift_p = jnp.dot(shift_c, st_ref[...], preferred_element_type=jnp.float32)
        return acc * scale_p + shift_p                           # (NH, WC)

    # ---- conv1: taps read directly from the padded ref (no full-value copy) ----
    taps1 = []
    for kh in range(3):
        for kw in range(3):
            t = xp_ref[:, kh:kh + H, kw * C:kw * C + WC]         # (N, H, WC)
            taps1.append(t.reshape(NH, WC).astype(jnp.bfloat16))
    acc1 = conv_packed(taps1, wb1_ref)

    # ---- bn1 + relu ----
    mid = jnp.maximum(batchnorm_packed(acc1, g1_ref, b1_ref), 0.0)

    # ---- conv2: re-pad the intermediate with concatenated zero borders ----
    mid_b = mid.astype(jnp.bfloat16).reshape(N, H, WC)
    zrow = jnp.zeros((N, 1, WC), jnp.bfloat16)
    zcol = jnp.zeros((N, H + 2, C), jnp.bfloat16)
    midp = jnp.concatenate([zrow, mid_b, zrow], axis=1)          # (N, H+2, WC)
    midp = jnp.concatenate([zcol, midp, zcol], axis=2)           # (N, H+2, (W+2)*C)
    taps2 = []
    for kh in range(3):
        for kw in range(3):
            t = midp[:, kh:kh + H, kw * C:kw * C + WC]
            taps2.append(t.reshape(NH, WC))
    acc2 = conv_packed(taps2, wb2_ref)

    # ---- bn2 + residual add + relu ----
    out = batchnorm_packed(acc2, g2_ref, b2_ref)
    identity = xp_ref[:, 1:H + 1, C:C + WC].reshape(NH, WC)      # original x, f32
    o_ref[...] = jnp.maximum(out + identity, 0.0).astype(o_ref.dtype)


def basic_block_pallas(x_nchw, w1_oihw, w2_oihw, g1, b1, g2, b2):
    N, Cin, H, W = x_nchw.shape
    Cout = w1_oihw.shape[0]
    assert Cin == Cout, "no downsample: inplanes must equal planes"
    C = Cin
    WC = W * C

    # --- pack input: NCHW -> padded NHWC -> (N, H+2, (W+2)*C) ---
    x_nhwc = jnp.transpose(x_nchw, (0, 2, 3, 1))
    x_pad = jnp.pad(x_nhwc, ((0, 0), (1, 1), (1, 1), (0, 0)))
    x_packed = x_pad.reshape(N, H + 2, (W + 2) * C)

    # --- block-diagonal im2col weights (XLA-side, hoisted out of the kernel) ---
    def pack_weights(w_oihw):
        w_hwio = jnp.transpose(w_oihw, (2, 3, 1, 0)).astype(jnp.float32)  # (3,3,Ci,Co)
        eye_w = jnp.eye(W, dtype=jnp.float32)
        blocks = [jnp.kron(eye_w, w_hwio[kh, kw])
                  for kh in range(3) for kw in range(3)]                   # each (W*Ci, W*Co)
        return jnp.concatenate(blocks, axis=0).astype(jnp.bfloat16)        # (9*W*Ci, W*Co)

    wb1 = pack_weights(w1_oihw)
    wb2 = pack_weights(w2_oihw)

    # selector matrices for per-channel batch stats in the packed lane layout
    s_mat = jnp.tile(jnp.eye(C, dtype=jnp.float32), (W, 1))   # (W*C, C)
    st_mat = s_mat.T                                          # (C, W*C)

    out_packed = pl.pallas_call(
        basic_block_kernel,
        out_shape=jax.ShapeDtypeStruct((N * H, WC), x_nchw.dtype),
        in_specs=[pl.BlockSpec(memory_space=pltpu.MemorySpace.VMEM)] * 9,
        out_specs=pl.BlockSpec(memory_space=pltpu.MemorySpace.VMEM),
        compiler_params=pltpu.CompilerParams(vmem_limit_bytes=32 * 1024 * 1024),
    )(x_packed, wb1, wb2, s_mat, st_mat,
      g1.reshape(1, -1).astype(jnp.float32), b1.reshape(1, -1).astype(jnp.float32),
      g2.reshape(1, -1).astype(jnp.float32), b2.reshape(1, -1).astype(jnp.float32))

    # --- unpack: (N*H, W*C) -> NCHW (layout plumbing stays in XLA) ---
    out_nhwc = out_packed.reshape(N, H, W, C)
    return jnp.transpose(out_nhwc, (0, 3, 1, 2))


def basic_block_reference(x, w1, w2, g1, b1, g2, b2, *, bf16_conv=False):
    """Plain-JAX reference mirroring PyTorch semantics (NCHW).

    bf16_conv=True casts conv operands to bf16 (f32 accumulation) to match the
    kernel's MXU precision exactly; bf16_conv=False is pure-f32 PyTorch math.
    """
    def conv(t, w):
        if bf16_conv:
            t, w = t.astype(jnp.bfloat16), w.astype(jnp.bfloat16)
        return jax.lax.conv_general_dilated(
            t, w, window_strides=(1, 1), padding=((1, 1), (1, 1)),
            dimension_numbers=('NCHW', 'OIHW', 'NCHW'),
            preferred_element_type=jnp.float32)

    def bn(t, g, b):
        mean = jnp.mean(t, axis=(0, 2, 3), keepdims=True)
        var = jnp.mean((t - mean) ** 2, axis=(0, 2, 3), keepdims=True)
        return ((t - mean) * jax.lax.rsqrt(var + EPS)
                * g.reshape(1, -1, 1, 1) + b.reshape(1, -1, 1, 1))

    out = jax.nn.relu(bn(conv(x, w1), g1, b1))
    out = bn(conv(out, w2), g2, b2)
    return jax.nn.relu(out + x)


if __name__ == "__main__":
    key = jax.random.PRNGKey(0)
    N, C, H, W = 2, 4, 16, 16         # inplanes = planes = 4, stride = 1
    k_x, k_w1, k_w2 = jax.random.split(key, 3)

    x = jax.random.normal(k_x, (N, C, H, W), jnp.float32)
    # conv weights: (out_planes, in_planes, 3, 3), bias=False
    w1 = jax.random.normal(k_w1, (C, C, 3, 3), jnp.float32) * 0.1
    w2 = jax.random.normal(k_w2, (C, C, 3, 3), jnp.float32) * 0.1
    # BatchNorm2d default init: weight=1, bias=0
    g1 = jnp.ones((C,), jnp.float32)
    b1 = jnp.zeros((C,), jnp.float32)
    g2 = jnp.ones((C,), jnp.float32)
    b2 = jnp.zeros((C,), jnp.float32)

    out = basic_block_pallas(x, w1, w2, g1, b1, g2, b2)
    out = jax.block_until_ready(out)
    assert out.shape == (N, C, H, W)

    # 1) tight check vs. a reference using the same bf16 MXU operand precision
    ref_bf16 = basic_block_reference(x, w1, w2, g1, b1, g2, b2, bf16_conv=True)
    err_bf16 = float(jnp.max(jnp.abs(out - ref_bf16)))
    assert jnp.allclose(out, ref_bf16, atol=1e-2, rtol=1e-2), \
        f"max abs diff vs bf16-precision reference: {err_bf16}"

    # 2) loose check vs. pure-f32 PyTorch semantics (bf16 rounding only)
    ref_f32 = basic_block_reference(x, w1, w2, g1, b1, g2, b2, bf16_conv=False)
    err_f32 = float(jnp.max(jnp.abs(out - ref_f32)))
    assert jnp.allclose(out, ref_f32, atol=6e-2, rtol=6e-2), \
        f"max abs diff vs f32 reference: {err_f32}"

    print("KERNEL_OK")
</pallas_src>

<mosaic_0001>
module attributes {stable_mosaic.version = 11 : i64} {
  func.func @basic_block_kernel(%arg0: memref<2x18x72xf32, #tpu.memory_space<vmem>>, %arg1: memref<576x64xbf16, #tpu.memory_space<vmem>>, %arg2: memref<576x64xbf16, #tpu.memory_space<vmem>>, %arg3: memref<64x4xf32, #tpu.memory_space<vmem>>, %arg4: memref<4x64xf32, #tpu.memory_space<vmem>>, %arg5: memref<1x4xf32, #tpu.memory_space<vmem>>, %arg6: memref<1x4xf32, #tpu.memory_space<vmem>>, %arg7: memref<1x4xf32, #tpu.memory_space<vmem>>, %arg8: memref<1x4xf32, #tpu.memory_space<vmem>>, %arg9: memref<32x64xf32, #tpu.memory_space<vmem>>) attributes {dimension_semantics = [], scalar_prefetch = 0 : i64, scratch_operands = 0 : i64, tpu.core_type = #tpu.core_type<tc>} {
    %c0 = arith.constant 0 : index
    %c0_0 = arith.constant 0 : index
    %c0_1 = arith.constant 0 : index
    %0 = vector.load %arg0[%c0, %c0_0, %c0_1] : memref<2x18x72xf32, #tpu.memory_space<vmem>>, vector<2x16x64xf32>
    %1 = vector.shape_cast %0 : vector<2x16x64xf32> to vector<32x64xf32>
    %2 = arith.truncf %1 : vector<32x64xf32> to vector<32x64xbf16>
    %c0_2 = arith.constant 0 : index
    %c0_3 = arith.constant 0 : index
    %c4 = arith.constant 4 : index
    %3 = vector.load %arg0[%c0_2, %c0_3, %c4] : memref<2x18x72xf32, #tpu.memory_space<vmem>>, vector<2x16x64xf32>
    %4 = vector.shape_cast %3 : vector<2x16x64xf32> to vector<32x64xf32>
    %5 = arith.truncf %4 : vector<32x64xf32> to vector<32x64xbf16>
    %c0_4 = arith.constant 0 : index
    %c0_5 = arith.constant 0 : index
    %c8 = arith.constant 8 : index
    %6 = vector.load %arg0[%c0_4, %c0_5, %c8] : memref<2x18x72xf32, #tpu.memory_space<vmem>>, vector<2x16x64xf32>
    %7 = vector.shape_cast %6 : vector<2x16x64xf32> to vector<32x64xf32>
    %8 = arith.truncf %7 : vector<32x64xf32> to vector<32x64xbf16>
    %c0_6 = arith.constant 0 : index
    %c1 = arith.constant 1 : index
    %c0_7 = arith.constant 0 : index
    %9 = vector.load %arg0[%c0_6, %c1, %c0_7] : memref<2x18x72xf32, #tpu.memory_space<vmem>>, vector<2x16x64xf32>
    %10 = vector.shape_cast %9 : vector<2x16x64xf32> to vector<32x64xf32>
    %11 = arith.truncf %10 : vector<32x64xf32> to vector<32x64xbf16>
    %c0_8 = arith.constant 0 : index
    %c1_9 = arith.constant 1 : index
    %c4_10 = arith.constant 4 : index
    %12 = vector.load %arg0[%c0_8, %c1_9, %c4_10] : memref<2x18x72xf32, #tpu.memory_space<vmem>>, vector<2x16x64xf32>
    %13 = vector.shape_cast %12 : vector<2x16x64xf32> to vector<32x64xf32>
    %14 = arith.truncf %13 : vector<32x64xf32> to vector<32x64xbf16>
    %c0_11 = arith.constant 0 : index
    %c1_12 = arith.constant 1 : index
    %c8_13 = arith.constant 8 : index
    %15 = vector.load %arg0[%c0_11, %c1_12, %c8_13] : memref<2x18x72xf32, #tpu.memory_space<vmem>>, vector<2x16x64xf32>
    %16 = vector.shape_cast %15 : vector<2x16x64xf32> to vector<32x64xf32>
    %17 = arith.truncf %16 : vector<32x64xf32> to vector<32x64xbf16>
    %c0_14 = arith.constant 0 : index
    %c2 = arith.constant 2 : index
    %c0_15 = arith.constant 0 : index
    %18 = vector.load %arg0[%c0_14, %c2, %c0_15] : memref<2x18x72xf32, #tpu.memory_space<vmem>>, vector<2x16x64xf32>
    %19 = vector.shape_cast %18 : vector<2x16x64xf32> to vector<32x64xf32>
    %20 = arith.truncf %19 : vector<32x64xf32> to vector<32x64xbf16>
    %c0_16 = arith.constant 0 : index
    %c2_17 = arith.constant 2 : index
    %c4_18 = arith.constant 4 : index
    %21 = vector.load %arg0[%c0_16, %c2_17, %c4_18] : memref<2x18x72xf32, #tpu.memory_space<vmem>>, vector<2x16x64xf32>
    %22 = vector.shape_cast %21 : vector<2x16x64xf32> to vector<32x64xf32>
    %23 = arith.truncf %22 : vector<32x64xf32> to vector<32x64xbf16>
    %c0_19 = arith.constant 0 : index
    %c2_20 = arith.constant 2 : index
    %c8_21 = arith.constant 8 : index
    %24 = vector.load %arg0[%c0_19, %c2_20, %c8_21] : memref<2x18x72xf32, #tpu.memory_space<vmem>>, vector<2x16x64xf32>
    %25 = vector.shape_cast %24 : vector<2x16x64xf32> to vector<32x64xf32>
    %26 = arith.truncf %25 : vector<32x64xf32> to vector<32x64xbf16>
    %27 = tpu.concatenate %2, %5, %8, %11, %14, %17, %20, %23, %26 in 1 : vector<32x64xbf16>, vector<32x64xbf16>, vector<32x64xbf16>, vector<32x64xbf16>, vector<32x64xbf16>, vector<32x64xbf16>, vector<32x64xbf16>, vector<32x64xbf16>, vector<32x64xbf16> -> vector<32x576xbf16>
    %c0_22 = arith.constant 0 : index
    %c0_23 = arith.constant 0 : index
    %28 = vector.load %arg1[%c0_22, %c0_23] : memref<576x64xbf16, #tpu.memory_space<vmem>>, vector<576x64xbf16>
    %cst = arith.constant dense<0.000000e+00> : vector<32x64xf32>
    %29 = tpu.matmul %27, %28, %cst {dimension_numbers = #tpu.dot_dimension_numbers<[1], [0], [0], [1], [0, 0, 1, 1], [], []>} : vector<32x576xbf16>, vector<576x64xbf16>, vector<32x64xf32> -> vector<32x64xf32>
    %cst_24 = arith.constant 1.000000e+00 : f32
    %30 = vector.broadcast %cst_24 : f32 to vector<1x32xf32>
    %31 = arith.mulf %29, %29 : vector<32x64xf32>
    %32 = tpu.concatenate %29, %31 in 1 : vector<32x64xf32>, vector<32x64xf32> -> vector<32x128xf32>
    %cst_25 = arith.constant dense<0.000000e+00> : vector<1x128xf32>
    %33 = tpu.matmul %30, %32, %cst_25 {dimension_numbers = #tpu.dot_dimension_numbers<[1], [0], [0], [1], [0, 0, 1, 1], [], []>} : vector<1x32xf32>, vector<32x128xf32>, vector<1x128xf32> -> vector<1x128xf32>
    %34 = vector.extract_strided_slice %33 {offsets = [0, 0], sizes = [1, 64], strides = [1, 1]} : vector<1x128xf32> to vector<1x64xf32>
    %35 = vector.extract_strided_slice %33 {offsets = [0, 64], sizes = [1, 64], strides = [1, 1]} : vector<1x128xf32> to vector<1x64xf32>
    %36 = tpu.concatenate %34, %35 in 0 : vector<1x64xf32>, vector<1x64xf32> -> vector<2x64xf32>
    %c0_26 = arith.constant 0 : index
    %c0_27 = arith.constant 0 : index
    %37 = vector.load %arg3[%c0_26, %c0_27] : memref<64x4xf32, #tpu.memory_space<vmem>>, vector<64x4xf32>
    %cst_28 = arith.constant dense<0.000000e+00> : vector<2x4xf32>
    %38 = tpu.matmul %36, %37, %cst_28 {dimension_numbers = #tpu.dot_dimension_numbers<[1], [0], [0], [1], [0, 0, 1, 1], [], []>} : vector<2x64xf32>, vector<64x4xf32>, vector<2x4xf32> -> vector<2x4xf32>
    %39 = vector.extract_strided_slice %38 {offsets = [0, 0], sizes = [1, 4], strides = [1, 1]} : vector<2x4xf32> to vector<1x4xf32>
    %cst_29 = arith.constant 0.001953125 : f32
    %40 = vector.broadcast %cst_29 : f32 to vector<1x4xf32>
    %41 = arith.mulf %39, %40 : vector<1x4xf32>
    %42 = vector.extract_strided_slice %38 {offsets = [1, 0], sizes = [1, 4], strides = [1, 1]} : vector<2x4xf32> to vector<1x4xf32>
    %cst_30 = arith.constant 0.001953125 : f32
    %43 = vector.broadcast %cst_30 : f32 to vector<1x4xf32>
    %44 = arith.mulf %42, %43 : vector<1x4xf32>
    %45 = arith.mulf %41, %41 : vector<1x4xf32>
    %46 = arith.subf %44, %45 : vector<1x4xf32>
    %cst_31 = arith.constant 0.000000e+00 : f32
    %47 = vector.broadcast %cst_31 : f32 to vector<1x4xf32>
    %48 = arith.maximumf %46, %47 : vector<1x4xf32>
    %c0_32 = arith.constant 0 : index
    %c0_33 = arith.constant 0 : index
    %49 = vector.load %arg5[%c0_32, %c0_33] : memref<1x4xf32, #tpu.memory_space<vmem>>, vector<1x4xf32>
    %cst_34 = arith.constant 9.99999974E-6 : f32
    %50 = vector.broadcast %cst_34 : f32 to vector<1x4xf32>
    %51 = arith.addf %48, %50 : vector<1x4xf32>
    %52 = math.rsqrt %51 : vector<1x4xf32>
    %53 = arith.mulf %49, %52 : vector<1x4xf32>
    %c0_35 = arith.constant 0 : index
    %c0_36 = arith.constant 0 : index
    %54 = vector.load %arg6[%c0_35, %c0_36] : memref<1x4xf32, #tpu.memory_space<vmem>>, vector<1x4xf32>
    %55 = arith.mulf %41, %53 : vector<1x4xf32>
    %56 = arith.subf %54, %55 : vector<1x4xf32>
    %c0_37 = arith.constant 0 : index
    %c0_38 = arith.constant 0 : index
    %57 = vector.load %arg4[%c0_37, %c0_38] : memref<4x64xf32, #tpu.memory_space<vmem>>, vector<4x64xf32>
    %cst_39 = arith.constant dense<0.000000e+00> : vector<1x64xf32>
    %58 = tpu.matmul %53, %57, %cst_39 {dimension_numbers = #tpu.dot_dimension_numbers<[1], [0], [0], [1], [0, 0, 1, 1], [], []>} : vector<1x4xf32>, vector<4x64xf32>, vector<1x64xf32> -> vector<1x64xf32>
    %c0_40 = arith.constant 0 : index
    %c0_41 = arith.constant 0 : index
    %59 = vector.load %arg4[%c0_40, %c0_41] : memref<4x64xf32, #tpu.memory_space<vmem>>, vector<4x64xf32>
    %cst_42 = arith.constant dense<0.000000e+00> : vector<1x64xf32>
    %60 = tpu.matmul %56, %59, %cst_42 {dimension_numbers = #tpu.dot_dimension_numbers<[1], [0], [0], [1], [0, 0, 1, 1], [], []>} : vector<1x4xf32>, vector<4x64xf32>, vector<1x64xf32> -> vector<1x64xf32>
    %61 = vector.broadcast %58 : vector<1x64xf32> to vector<32x64xf32>
    %62 = arith.mulf %29, %61 : vector<32x64xf32>
    %63 = vector.broadcast %60 : vector<1x64xf32> to vector<32x64xf32>
    %64 = arith.addf %62, %63 : vector<32x64xf32>
    %cst_43 = arith.constant 0.000000e+00 : f32
    %65 = vector.broadcast %cst_43 : f32 to vector<32x64xf32>
    %66 = arith.maximumf %64, %65 : vector<32x64xf32>
    %67 = arith.truncf %66 : vector<32x64xf32> to vector<32x64xbf16>
    %68 = vector.shape_cast %67 : vector<32x64xbf16> to vector<2x16x64xbf16>
    %cst_44 = arith.constant 0.000000e+00 : bf16
    %69 = vector.broadcast %cst_44 : bf16 to vector<2x1x64xbf16>
    %cst_45 = arith.constant 0.000000e+00 : bf16
    %70 = vector.broadcast %cst_45 : bf16 to vector<2x18x4xbf16>
    %71 = tpu.concatenate %69, %68, %69 in 1 : vector<2x1x64xbf16>, vector<2x16x64xbf16>, vector<2x1x64xbf16> -> vector<2x18x64xbf16>
    %72 = tpu.concatenate %70, %71, %70 in 2 : vector<2x18x4xbf16>, vector<2x18x64xbf16>, vector<2x18x4xbf16> -> vector<2x18x72xbf16>
    %73 = vector.extract_strided_slice %72 {offsets = [0, 0, 0], sizes = [2, 16, 64], strides = [1, 1, 1]} : vector<2x18x72xbf16> to vector<2x16x64xbf16>
    %74 = vector.shape_cast %73 : vector<2x16x64xbf16> to vector<32x64xbf16>
    %75 = vector.extract_strided_slice %72 {offsets = [0, 0, 4], sizes = [2, 16, 64], strides = [1, 1, 1]} : vector<2x18x72xbf16> to vector<2x16x64xbf16>
    %76 = vector.shape_cast %75 : vector<2x16x64xbf16> to vector<32x64xbf16>
    %77 = vector.extract_strided_slice %72 {offsets = [0, 0, 8], sizes = [2, 16, 64], strides = [1, 1, 1]} : vector<2x18x72xbf16> to vector<2x16x64xbf16>
    %78 = vector.shape_cast %77 : vector<2x16x64xbf16> to vector<32x64xbf16>
    %79 = vector.extract_strided_slice %72 {offsets = [0, 1, 0], sizes = [2, 16, 64], strides = [1, 1, 1]} : vector<2x18x72xbf16> to vector<2x16x64xbf16>
    %80 = vector.shape_cast %79 : vector<2x16x64xbf16> to vector<32x64xbf16>
    %81 = vector.extract_strided_slice %72 {offsets = [0, 1, 4], sizes = [2, 16, 64], strides = [1, 1, 1]} : vector<2x18x72xbf16> to vector<2x16x64xbf16>
    %82 = vector.shape_cast %81 : vector<2x16x64xbf16> to vector<32x64xbf16>
    %83 = vector.extract_strided_slice %72 {offsets = [0, 1, 8], sizes = [2, 16, 64], strides = [1, 1, 1]} : vector<2x18x72xbf16> to vector<2x16x64xbf16>
    %84 = vector.shape_cast %83 : vector<2x16x64xbf16> to vector<32x64xbf16>
    %85 = vector.extract_strided_slice %72 {offsets = [0, 2, 0], sizes = [2, 16, 64], strides = [1, 1, 1]} : vector<2x18x72xbf16> to vector<2x16x64xbf16>
    %86 = vector.shape_cast %85 : vector<2x16x64xbf16> to vector<32x64xbf16>
    %87 = vector.extract_strided_slice %72 {offsets = [0, 2, 4], sizes = [2, 16, 64], strides = [1, 1, 1]} : vector<2x18x72xbf16> to vector<2x16x64xbf16>
    %88 = vector.shape_cast %87 : vector<2x16x64xbf16> to vector<32x64xbf16>
    %89 = vector.extract_strided_slice %72 {offsets = [0, 2, 8], sizes = [2, 16, 64], strides = [1, 1, 1]} : vector<2x18x72xbf16> to vector<2x16x64xbf16>
    %90 = vector.shape_cast %89 : vector<2x16x64xbf16> to vector<32x64xbf16>
    %91 = tpu.concatenate %74, %76, %78, %80, %82, %84, %86, %88, %90 in 1 : vector<32x64xbf16>, vector<32x64xbf16>, vector<32x64xbf16>, vector<32x64xbf16>, vector<32x64xbf16>, vector<32x64xbf16>, vector<32x64xbf16>, vector<32x64xbf16>, vector<32x64xbf16> -> vector<32x576xbf16>
    %c0_46 = arith.constant 0 : index
    %c0_47 = arith.constant 0 : index
    %92 = vector.load %arg2[%c0_46, %c0_47] : memref<576x64xbf16, #tpu.memory_space<vmem>>, vector<576x64xbf16>
    %cst_48 = arith.constant dense<0.000000e+00> : vector<32x64xf32>
    %93 = tpu.matmul %91, %92, %cst_48 {dimension_numbers = #tpu.dot_dimension_numbers<[1], [0], [0], [1], [0, 0, 1, 1], [], []>} : vector<32x576xbf16>, vector<576x64xbf16>, vector<32x64xf32> -> vector<32x64xf32>
    %cst_49 = arith.constant 1.000000e+00 : f32
    %94 = vector.broadcast %cst_49 : f32 to vector<1x32xf32>
    %95 = arith.mulf %93, %93 : vector<32x64xf32>
    %96 = tpu.concatenate %93, %95 in 1 : vector<32x64xf32>, vector<32x64xf32> -> vector<32x128xf32>
    %cst_50 = arith.constant dense<0.000000e+00> : vector<1x128xf32>
    %97 = tpu.matmul %94, %96, %cst_50 {dimension_numbers = #tpu.dot_dimension_numbers<[1], [0], [0], [1], [0, 0, 1, 1], [], []>} : vector<1x32xf32>, vector<32x128xf32>, vector<1x128xf32> -> vector<1x128xf32>
    %98 = vector.extract_strided_slice %97 {offsets = [0, 0], sizes = [1, 64], strides = [1, 1]} : vector<1x128xf32> to vector<1x64xf32>
    %99 = vector.extract_strided_slice %97 {offsets = [0, 64], sizes = [1, 64], strides = [1, 1]} : vector<1x128xf32> to vector<1x64xf32>
    %100 = tpu.concatenate %98, %99 in 0 : vector<1x64xf32>, vector<1x64xf32> -> vector<2x64xf32>
    %c0_51 = arith.constant 0 : index
    %c0_52 = arith.constant 0 : index
    %101 = vector.load %arg3[%c0_51, %c0_52] : memref<64x4xf32, #tpu.memory_space<vmem>>, vector<64x4xf32>
    %cst_53 = arith.constant dense<0.000000e+00> : vector<2x4xf32>
    %102 = tpu.matmul %100, %101, %cst_53 {dimension_numbers = #tpu.dot_dimension_numbers<[1], [0], [0], [1], [0, 0, 1, 1], [], []>} : vector<2x64xf32>, vector<64x4xf32>, vector<2x4xf32> -> vector<2x4xf32>
    %103 = vector.extract_strided_slice %102 {offsets = [0, 0], sizes = [1, 4], strides = [1, 1]} : vector<2x4xf32> to vector<1x4xf32>
    %cst_54 = arith.constant 0.001953125 : f32
    %104 = vector.broadcast %cst_54 : f32 to vector<1x4xf32>
    %105 = arith.mulf %103, %104 : vector<1x4xf32>
    %106 = vector.extract_strided_slice %102 {offsets = [1, 0], sizes = [1, 4], strides = [1, 1]} : vector<2x4xf32> to vector<1x4xf32>
    %cst_55 = arith.constant 0.001953125 : f32
    %107 = vector.broadcast %cst_55 : f32 to vector<1x4xf32>
    %108 = arith.mulf %106, %107 : vector<1x4xf32>
    %109 = arith.mulf %105, %105 : vector<1x4xf32>
    %110 = arith.subf %108, %109 : vector<1x4xf32>
    %cst_56 = arith.constant 0.000000e+00 : f32
    %111 = vector.broadcast %cst_56 : f32 to vector<1x4xf32>
    %112 = arith.maximumf %110, %111 : vector<1x4xf32>
    %c0_57 = arith.constant 0 : index
    %c0_58 = arith.constant 0 : index
    %113 = vector.load %arg7[%c0_57, %c0_58] : memref<1x4xf32, #tpu.memory_space<vmem>>, vector<1x4xf32>
    %cst_59 = arith.constant 9.99999974E-6 : f32
    %114 = vector.broadcast %cst_59 : f32 to vector<1x4xf32>
    %115 = arith.addf %112, %114 : vector<1x4xf32>
    %116 = math.rsqrt %115 : vector<1x4xf32>
    %117 = arith.mulf %113, %116 : vector<1x4xf32>
    %c0_60 = arith.constant 0 : index
    %c0_61 = arith.constant 0 : index
    %118 = vector.load %arg8[%c0_60, %c0_61] : memref<1x4xf32, #tpu.memory_space<vmem>>, vector<1x4xf32>
    %119 = arith.mulf %105, %117 : vector<1x4xf32>
    %120 = arith.subf %118, %119 : vector<1x4xf32>
    %c0_62 = arith.constant 0 : index
    %c0_63 = arith.constant 0 : index
    %121 = vector.load %arg4[%c0_62, %c0_63] : memref<4x64xf32, #tpu.memory_space<vmem>>, vector<4x64xf32>
    %cst_64 = arith.constant dense<0.000000e+00> : vector<1x64xf32>
    %122 = tpu.matmul %117, %121, %cst_64 {dimension_numbers = #tpu.dot_dimension_numbers<[1], [0], [0], [1], [0, 0, 1, 1], [], []>} : vector<1x4xf32>, vector<4x64xf32>, vector<1x64xf32> -> vector<1x64xf32>
    %c0_65 = arith.constant 0 : index
    %c0_66 = arith.constant 0 : index
    %123 = vector.load %arg4[%c0_65, %c0_66] : memref<4x64xf32, #tpu.memory_space<vmem>>, vector<4x64xf32>
    %cst_67 = arith.constant dense<0.000000e+00> : vector<1x64xf32>
    %124 = tpu.matmul %120, %123, %cst_67 {dimension_numbers = #tpu.dot_dimension_numbers<[1], [0], [0], [1], [0, 0, 1, 1], [], []>} : vector<1x4xf32>, vector<4x64xf32>, vector<1x64xf32> -> vector<1x64xf32>
    %125 = vector.broadcast %122 : vector<1x64xf32> to vector<32x64xf32>
    %126 = arith.mulf %93, %125 : vector<32x64xf32>
    %127 = vector.broadcast %124 : vector<1x64xf32> to vector<32x64xf32>
    %128 = arith.addf %126, %127 : vector<32x64xf32>
    %c0_68 = arith.constant 0 : index
    %c1_69 = arith.constant 1 : index
    %c4_70 = arith.constant 4 : index
    %129 = vector.load %arg0[%c0_68, %c1_69, %c4_70] : memref<2x18x72xf32, #tpu.memory_space<vmem>>, vector<2x16x64xf32>
    %130 = vector.shape_cast %129 : vector<2x16x64xf32> to vector<32x64xf32>
    %131 = arith.addf %128, %130 : vector<32x64xf32>
    %cst_71 = arith.constant 0.000000e+00 : f32
    %132 = vector.broadcast %cst_71 : f32 to vector<32x64xf32>
    %133 = arith.maximumf %131, %132 : vector<32x64xf32>
    %c0_72 = arith.constant 0 : index
    %c0_73 = arith.constant 0 : index
    %134 = vector.load %arg9[%c0_72, %c0_73] : memref<32x64xf32, #tpu.memory_space<vmem>>, vector<32x64xf32>
    tpu.vector_store %arg9[%c0_72, %c0_73], %133 {strides = array<i32>} : memref<32x64xf32, #tpu.memory_space<vmem>>, vector<32x64xf32>,
    return
  }
}

</mosaic_0001>

<bundles_post_ra>
// kernel: tpu_custom_call.1
= control target key start
LH: loop header
LB: loop body
LE: loop exit
PB: predicated region body
PF: predicated region fallthrough
CT: control target
= control target key end

     0   :  { %s2469_s23 = smov 60   ;;  %s2470_s24 = smov 120   ;;  %s3079_s0 = inlined_call_operand.vmem [shape: f32[2,18,72], index: 0, kind: input, shape index: {}]   ;;  %s3080_s1 = inlined_call_operand.vmem [shape: bf16[576,64], index: 1, kind: input, shape index: {}]   ;;  %s3081_s2 = inlined_call_operand.vmem [shape: bf16[576,64], index: 2, kind: input, shape index: {}]   ;;  %s3082_s3 = inlined_call_operand.vmem [shape: f32[64,4], index: 3, kind: input, shape index: {}]   ;;  %s3083_s4 = inlined_call_operand.vmem [shape: f32[4,64], index: 4, kind: input, shape index: {}]   ;;  %s3084_s5 = inlined_call_operand.vmem [shape: f32[1,4], index: 5, kind: input, shape index: {}]   ;;  %s3085_s6 = inlined_call_operand.vmem [shape: f32[1,4], index: 6, kind: input, shape index: {}]   ;;  %s3086_s7 = inlined_call_operand.vmem [shape: f32[1,4], index: 7, kind: input, shape index: {}]   ;;  %s3087_s8 = inlined_call_operand.vmem [shape: f32[1,4], index: 8, kind: input, shape index: {}]   ;;  %s3088_s9 = inlined_call_operand.hbm [shape: f32[32,64], index: 9, kind: output, shape index: {}]  }
   0x1   :  { %v34_v0 = vld [vmem:[%s3079_s0] sm:$0xff]  ;;  %v35_v1 = vld [vmem:[%s3079_s0 + $0x8] sm:$0xff]  ;;  %v36_v2 = vld [vmem:[%s3079_s0 + $0x18] sm:$0xff]  ;;  %s2471_s14 = smov 64   ;;  %s2472_s15 = smov 124  }
   0x2   :  { %v2542_v3 = vpack.c.bf16 %v35_v1, %v34_v0  ;;  %v37_v4 = vld [vmem:[%s3079_s0 + $0x20] sm:$0xff]  ;;  %v41_v6 = vld [vmem:[%s3079_s0 + $0x9] sm:$0xff]  ;;  %v2372_v25 = vld [vmem:[%s3080_s1 + $0x58] sm:$0xff]   ;;  %s2473_s26 = smov 56  }
   0x3   :  { %v40_v5 = vld [vmem:[%s3079_s0 + $0x1] sm:$0xff]  ;;  %v2560_v8 = vpack.c.bf16 %v37_v4, %v36_v2  ;;  %v47_v10 = vld [vmem:[%s3079_s0 + $0xa] sm:$0xff]  ;;  %v42_v11 = vld [vmem:[%s3079_s0 + $0x19] sm:$0xff] }
   0x4   :  { %v46_v7 = vld [vmem:[%s3079_s0 + $0x2] sm:$0xff]  ;;  %54 = vrot.lane.b32.xlu1 %v2542_v3, %s2469_s23  ;;  %58 = vrot.lane.b32.xlu0 %v2542_v3, %s2470_s24  ;;  %v44_v9 = vpack.c.bf16 %v41_v6, %v40_v5  ;;  %v48_v19 = vld [vmem:[%s3079_s0 + $0x1a] sm:$0xff] }
   0x5   :  { %v43_v12 = vld [vmem:[%s3079_s0 + $0x21] sm:$0xff]  ;;  %v2580_v15 = vpack.c.bf16 %v47_v10, %v46_v7  ;;  %v2369_v21 = vld [vmem:[%s3080_s1 + $0x50] sm:$0xff]   ;;  %v2374_v27 = vld [vmem:[%s3080_s1 + $0x18] sm:$0xff]  }
   0x6   :  { %v2365_v13 = vld [vmem:[%s3080_s1 + $0x40] sm:$0xff]   ;;  %v45_v16 = vpack.c.bf16 %v43_v12, %v42_v11  ;;  %v2367_v17 = vld [vmem:[%s3080_s1 + $0x48] sm:$0xff]   ;;  %v2370_v23 = vld [vmem:[%s3080_s1 + $0x10] sm:$0xff]  }
   0x7   :  { %v2366_v14 = vld [vmem:[%s3080_s1] sm:$0xff]   ;;  %2031 = vmatprep.subr.bf16.mxu0 %v2365_v13  ;;  %v2368_v18 = vld [vmem:[%s3080_s1 + $0x8] sm:$0xff]   ;;  %v2379_v32 = vld [vmem:[%s3080_s1 + $0xd0] sm:$0xff]  }
   0x8   :  { %60 = vrot.lane.b32.xlu1 %v2560_v8, %s2470_s24  ;;  %64 = vrot.lane.b32.xlu0 %v44_v9, %s2471_s14  ;;  %v49_v20 = vld [vmem:[%s3079_s0 + $0x22] sm:$0xff]  ;;  %v2381_v34 = vld [vmem:[%s3080_s1 + $0x90] sm:$0xff]  }
   0x9   :  { %2032 = vmatpush3.bf16.msra.mxu0 %v2366_v14  ;;  %v2371_v22 = vld [vmem:[%s3080_s1 + $0xc0] sm:$0xff]   ;;  %v2615_v26 = vpack.c.bf16 %v49_v20, %v48_v19  ;;  %v2375_v28 = vld [vmem:[%s3080_s1 + $0xc8] sm:$0xff]   ;;  %v2383_v36 = vld [vmem:[%s3080_s1 + $0xd8] sm:$0xff]  }
   0xa   :  { %2033 = vmatprep.subr.bf16.mxu0 %v2367_v17  ;;  %2059 = vmatprep.subr.bf16.mxu1 %v2371_v22  ;;  %v2373_v24 = vld [vmem:[%s3080_s1 + $0x80] sm:$0xff]   ;;  %v2377_v30 = vld [vmem:[%s3080_s1 + $0x88] sm:$0xff]   ;;  %v2384_v37 = vld [vmem:[%s3080_s1 + $0x70] sm:$0xff]  }
   0xb   :  { %2060 = vmatpush3.bf16.msra.mxu1 %v2373_v24  ;;  %v2376_v29 = vld [vmem:[%s3080_s1 + $0x60] sm:$0xff]   ;;  %v2380_v33 = vld [vmem:[%s3080_s1 + $0x68] sm:$0xff]   ;;  %v2385_v38 = vld [vmem:[%s3080_s1 + $0x98] sm:$0xff]  }
   0xc   :  { %78 = vrot.lane.b32.xlu1 %v2580_v15, %s2469_s23  ;;  %66 = vrot.lane.b32.xlu0 %v45_v16, %s2471_s14  ;;  %v2378_v31 = vld [vmem:[%s3080_s1 + $0x20] sm:$0xff]   ;;  %v2382_v35 = vld [vmem:[%s3080_s1 + $0x28] sm:$0xff]  }
   0xd   :  { %2034 = vmatpush3.bf16.msra.mxu0 %v2368_v18  ;;  %2061 = vmatprep.subr.bf16.mxu1 %v2375_v28  ;;  %v2386_v39 = vld [vmem:[%s3080_s1 + $0x30] sm:$0xff]   ;;  %v2387_v40 = vld [vmem:[%s3080_s1 + $0xe0] sm:$0xff]   ;;  %v2388_v41 = vld [vmem:[%s3080_s1 + $0x78] sm:$0xff]  }
   0xe   :  { %2035 = vmatprep.subr.bf16.mxu0 %v2369_v21  ;;  %v2389_v42 = vld [vmem:[%s3080_s1 + $0xa0] sm:$0xff]   ;;  %v2390_v43 = vld [vmem:[%s3080_s1 + $0x38] sm:$0xff]   ;;  %v2391_v44 = vld [vmem:[%s3080_s1 + $0xe8] sm:$0xff]  }
   0xf   :  { %2062 = vmatpush3.bf16.msra.mxu1 %v2377_v30  ;;  %v2392_v45 = vld [vmem:[%s3080_s1 + $0xa8] sm:$0xff]   ;;  %v2393_v46 = vld [vmem:[%s3080_s1 + $0xf0] sm:$0xff]   ;;  %v2394_v47 = vld [vmem:[%s3080_s1 + $0x100] sm:$0xff]  }
  0x10   :  { %68 = vrot.lane.b32.xlu1 %v44_v9, %s2472_s15  ;;  %56 = vrot.lane.b32.xlu0 %v2560_v8, %s2469_s23  ;;  %v2395_v48 = vld [vmem:[%s3080_s1 + $0xb0] sm:$0xff]   ;;  %v2396_v49 = vld [vmem:[%s3080_s1 + $0xf8] sm:$0xff]  }
  0x11   :  { %2036 = vmatpush3.bf16.msra.mxu0 %v2370_v23  ;;  %2063 = vmatprep.subr.bf16.mxu1 %v2379_v32  ;;  %v2398_v50 = vld [vmem:[%s3080_s1 + $0xb8] sm:$0xff]  }
  0x12   :  { %2037 = vmatprep.subr.bf16.mxu0 %v2372_v25 }
  0x13   :  { %2064 = vmatpush3.bf16.msra.mxu1 %v2381_v34 }
  0x14   :  { %80 = vrot.lane.b32.xlu1 %v2615_v26, %s2469_s23  ;;  %72 = vrot.lane.b32.xlu0 %v44_v9, %s2473_s26 }
  0x15   :  { %2038 = vmatpush3.bf16.msra.mxu0 %v2374_v27  ;;  %2065 = vmatprep.subr.bf16.mxu1 %v2383_v36 }
  0x16   :  { %2039 = vmatprep.subr.bf16.mxu0 %v2376_v29 }
  0x17   :  { %2066 = vmatpush3.bf16.msra.mxu1 %v2385_v38 }
  0x18   :  { %74 = vrot.lane.b32.xlu1 %v45_v16, %s2473_s26  ;;  %70 = vrot.lane.b32.xlu0 %v45_v16, %s2472_s15 }
  0x19   :  { %2040 = vmatpush3.bf16.msra.mxu0 %v2378_v31  ;;  %2067 = vmatprep.subr.bf16.mxu1 %v2387_v40 }
  0x1a   :  { %2041 = vmatprep.subr.bf16.mxu0 %v2380_v33 }
  0x1b   :  { %2068 = vmatpush3.bf16.msra.mxu1 %v2389_v42 }
  0x1c   :  { %82 = vrot.lane.b32.xlu0 %v2580_v15, %s2470_s24  ;;  %84 = vrot.lane.b32.xlu1 %v2615_v26, %s2470_s24 }
  0x1d   :  { %2042 = vmatpush3.bf16.msra.mxu0 %v2382_v35  ;;  %2069 = vmatprep.subr.bf16.mxu1 %v2391_v44 }
  0x1e   :  { %2043 = vmatprep.subr.bf16.mxu0 %v2384_v37 }
  0x1f   :  { %2070 = vmatpush3.bf16.msra.mxu1 %v2392_v45 }
  0x20   :  { %2071 = vmatprep.subr.bf16.mxu1 %v2393_v46 }
  0x21   :  { %2044 = vmatpush3.bf16.msra.mxu0 %v2386_v39 }
  0x22   :  { %2045 = vmatprep.subr.bf16.mxu0 %v2388_v41 }
  0x23   :  { %2072 = vmatpush3.bf16.msra.mxu1 %v2395_v48 }
  0x24   :  { %2073 = vmatprep.subr.bf16.mxu1 %v2396_v49 }
  0x25   :  { %2046 = vmatpush3.bf16.msra.mxu0 %v2390_v43 }
  0x26   :  { %2191 = vmatprep.subr.bf16.mxu0 %v2394_v47 }
  0x27   :  { %2074 = vmatpush3.bf16.msra.mxu1 %v2398_v50 }
  0x28   :  { %14 = vsyncpa [#allocation3], 0  ;;  %vm86_vm0 = vcmask 523264   ;;  %v2397_v56 = vld [vmem:[%s3080_s1 + $0x108] sm:$0xff]   ;;  %v2399_v62 = vld [vmem:[%s3080_s1 + $0x110] sm:$0xff]   ;;  %v2474_v36 = vmov 0.0|0.0  }
  0x29   :  { %v2400_v2 = vld [vmem:[%s3080_s1 + $0x118] sm:$0xff]   ;;  %2295 = vmatprep.subr.bf16.mxu1 %v2474_v36  ;;  %vm2475_vm1 = vmmov 0   ;;  %vm584_vm2 = vcmask 261120   ;;  %vm663_vm3 = vcmask 1040384   ;;  %vm782_vm4 = vcmask 1043456  }
  0x2a   :  { %vm778_vm5 = vcmask 31744   ;;  %vm970_vm6 = vsmask.f32 256  ;;  %vm997_vm8 = vcmask 556032   ;;  %vm1002_vm9 = vsmask.f32 7424 }
  0x2b   :  { %vm971_vm7 = vmand %vm663_vm3, %vm970_vm6  ;;  %vm1027_vm10 = vcmask 1046528  }
  0x76   :  { %v55_v51 = vpop.permute.xlu1 %54  ;;  %v59_v52 = vpop.permute.xlu0 %58 }
  0x77   :  { %v89_v57 = vsel %vm86_vm0, %v2542_v3, %v55_v51 }
  0x7a   :  { %v61_v53 = vpop.permute.xlu1 %60  ;;  %v65_v54 = vpop.permute.xlu0 %64 }
  0x7b   :  { %v97_v55 = vsel %vm86_vm0, %v59_v52, %v65_v54  ;;  %v2476_v52 = vmov 0.0  }
  0x7c   :  { %445 = vmatprep.mubr.bf16.mxu0 %v97_v55 }
  0x7d   :  { %446 = vmatmul.mubr.bf16.vlgmr.msra.gmra.mrb[0].mxu0 %v89_v57 }
  0x7e   :  { %v79_v58 = vpop.permute.xlu1 %78  ;;  %v67_v59 = vpop.permute.xlu0 %66  ;;  %2192 = vmatpush3.bf16.msra.mxu0 %v2394_v47 }
  0x7f   :  { %v101_v60 = vsel %vm86_vm0, %v61_v53, %v67_v59  ;;  %v113_v61 = vsel %vm86_vm0, %v2580_v15, %v79_v58  ;;  %2193 = vmatprep.subr.bf16.mxu0 %v2397_v56 }
  0x80   :  { %453 = vmatprep.mubr.bf16.mxu0 %v101_v60  ;;  %494 = vmatprep.mubr.bf16.mxu1 %v113_v61 }
  0x82   :  { %v69_v63 = vpop.permute.xlu1 %68  ;;  %v57_v0 = vpop.permute.xlu0 %56  ;;  %2194 = vmatpush3.bf16.msra.mxu0 %v2397_v56 }
  0x83   :  { %v93_v1 = vsel %vm86_vm0, %v2560_v8, %v57_v0  ;;  %2195 = vmatprep.subr.bf16.mxu0 %v2399_v62 }
  0x85   :  { %454 = vmatmul.mubr.bf16.gmra.mrb[4].mxu0 %v93_v1 }
  0x86   :  { %v81_v3 = vpop.permute.xlu1 %80  ;;  %v73_v4 = vpop.permute.xlu0 %72  ;;  %2196 = vmatpush3.bf16.msra.mxu0 %v2399_v62 }
  0x87   :  { %v105_v5 = vsel %vm86_vm0, %v69_v63, %v73_v4  ;;  %v117_v6 = vsel %vm86_vm0, %v2615_v26, %v81_v3  ;;  %2197 = vmatprep.subr.bf16.mxu0 %v2400_v2  ;;  %v2477_v4 = vmov 1.0  }
  0x88   :  { %495 = vmatmul.mubr.bf16.vlgmr.msra.gmra.mrb[0].mxu1 %v105_v5  ;;  %v665_v5 = vld [vmem:[%s3082_s3] sm:$0xff] }
  0x89   :  { %502 = vmatprep.mubr.bf16.mxu1 %v117_v6  ;;  %v666_v6 = vld [vmem:[%s3082_s3 + $0x8] sm:$0xff] }
  0x8a   :  { %v75_v7 = vpop.permute.xlu1 %74  ;;  %v71_v9 = vpop.permute.xlu0 %70  ;;  %2198 = vmatpush3.bf16.msra.mxu0 %v2400_v2 }
  0x8b   :  { %v109_v11 = vsel %vm86_vm0, %v71_v9, %v75_v7  ;;  %2301 = vmatprep.subr.bf16.mxu0 %v2474_v36  ;;  %v667_v7 = vld [vmem:[%s3082_s3 + $0x10] sm:$0xff]  ;;  %v2768_v9 = vpack.c.bf16 %v666_v6, %v665_v5 }
  0x8e   :  { %v83_v8 = vpop.permute.xlu0 %82  ;;  %v85_v10 = vpop.permute.xlu1 %84 }
  0x8f   :  { %2199 = vmatprep.mubr.msk.bf16.mxu0 %vm86_vm0, %v83_v8  ;;  %v668_v8 = vld [vmem:[%s3082_s3 + $0x18] sm:$0xff] }
  0x90   :  { %503 = vmatmul.mubr.bf16.gmra.mrb[4].mxu1 %v109_v11  ;;  %2200 = vmatmul.mubr.msk.bf16.vlgmr.msra.gmra.mrb[8].mxu0 %vm86_vm0, %v85_v10  ;;  %v2774_v10 = vpack.c.bf16 %v668_v8, %v667_v7  ;;  %v669_v11 = vld [vmem:[%s3082_s3 + $0x20] sm:$0xff] }
  0x91   :  { %2211 = vmatprep.mubr.msk.f32.mxu1 %vm2475_vm1, %v2476_v52  ;;  %2230 = vmatprep.mubr.msk.f32.mxu0 %vm2475_vm1, %v2476_v52 }
  0x92   :  { %2303 = vmatpush3.bf16.msra.mxu0 %v2768_v9 }
  0x93   :  { %2304 = vmatprep.subr.bf16.mxu0 %v2474_v36 }
  0x96   :  { %2306 = vmatpush3.bf16.msra.mxu0 %v2774_v10 }
  0x97   :  { %2307 = vmatprep.subr.bf16.mxu0 %v2474_v36 }
 0x150   :  { %v2047_v12 = vpop.f32.mrb[0].mxu0 }
 0x151   :  { %v2048_v13 = vpop.f32.mrb[1].mxu0 }
 0x152   :  { %v2049_v14 = vadd.f32 %v2048_v13, %v2047_v12  ;;  %v2050_v15 = vpop.f32.mrb[2].mxu0  ;;  %v670_v12 = vld [vmem:[%s3082_s3 + $0x28] sm:$0xff] }
 0x153   :  { %v2051_v16 = vpop.f32.mrb[3].mxu0  ;;  %v2784_v13 = vpack.c.bf16 %v670_v12, %v669_v11 }
 0x154   :  { %v2052_v17 = vadd.f32 %v2051_v16, %v2050_v15  ;;  %v672_v15 = vld [vmem:[%s3082_s3 + $0x38] sm:$0xff] }
 0x155   :  { %2309 = vmatpush3.bf16.msra.mxu0 %v2784_v13 }
 0x156   :  { %2310 = vmatprep.subr.bf16.mxu0 %v2474_v36 }
 0x158   :  { %v2053_v18 = vpop.f32.mrb[4].mxu0 }
 0x159   :  { %v2054_v19 = vpop.f32.mrb[5].mxu0 }
 0x15a   :  { %v2055_v20 = vadd.f32 %v2054_v19, %v2053_v18  ;;  %v2056_v21 = vpop.f32.mrb[6].mxu0 }
 0x15b   :  { %v2057_v22 = vpop.f32.mrb[7].mxu0  ;;  %v2075_v23 = vpop.f32.mrb[0].mxu1 }
 0x15c   :  { %v2058_v24 = vadd.f32 %v2057_v22, %v2056_v21  ;;  %v2076_v25 = vpop.f32.mrb[1].mxu1  ;;  %v2804_v22 = vld [vmem:[%s3083_s4] sm:$0xf] }
 0x15d   :  { %v2077_v26 = vadd.f32 %v2076_v25, %v2075_v23  ;;  %v2078_v27 = vpop.f32.mrb[2].mxu1 }
 0x15e   :  { %v2079_v28 = vpop.f32.mrb[3].mxu1 }
 0x15f   :  { %v2080_v29 = vadd.f32 %v2079_v28, %v2078_v27  ;;  %v497_v30 = vadd.f32 %v2077_v26, %v2049_v14  ;;  %v671_v14 = vld [vmem:[%s3082_s3 + $0x30] sm:$0xff] }
 0x160   :  { %v2794_v16 = vpack.c.bf16 %v672_v15, %v671_v14 }
 0x161   :  { %v500_v31 = vadd.f32 %v2080_v29, %v2052_v17 }
 0x162   :  { %2312 = vmatpush3.bf16.msra.mxu0 %v2794_v16 }
 0x163   :  { %v2081_v32 = vpop.f32.mrb[4].mxu1  ;;  %v2201_v33 = vpop.f32.mrb[8].mxu0 }
 0x164   :  { %v2082_v34 = vpop.f32.mrb[5].mxu1  ;;  %v545_v35 = vpop.f32.mrb[9].mxu0 }
 0x165   :  { %v2083_v37 = vadd.f32 %v2082_v34, %v2081_v32  ;;  %v2723_v38 = vadd.f32 %v545_v35, %v497_v30  ;;  %v2084_v39 = vpop.f32.mrb[6].mxu1  ;;  %v2202_v40 = vpop.f32.mrb[10].mxu0 }
 0x166   :  { %v2085_v41 = vpop.f32.mrb[7].mxu1  ;;  %v548_v42 = vpop.f32.mrb[11].mxu0 }
 0x167   :  { %v505_v43 = vadd.f32 %v2083_v37, %v2055_v20  ;;  %v2086_v44 = vadd.f32 %v2085_v41, %v2084_v39  ;;  %v2725_v45 = vadd.f32 %v548_v42, %v500_v31  ;;  %v560_v46 = vmul.f32 %v2723_v38, %v2723_v38  ;;  %v753_v42 = vld [vmem:[%s3084_s5] sm:$0x1]  ;;  %s2479_s5 = smov 4  }
 0x168   :  { %v2478_v31 = vmov 1966171168  }
 0x169   :  { %v2729_v47 = vadd.f32 %v2201_v33, %v505_v43  ;;  %v508_v48 = vadd.f32 %v2086_v44, %v2058_v24  ;;  %v561_v49 = vmul.f32 %v2725_v45, %v2725_v45  ;;  %v758_v32 = vunpack.c.l.s4 %v2478_v31  ;;  %v2411_v31 = vld [vmem:[%s3081_s2 + $0x88] sm:$0xff]  }
 0x16a   :  { %v760_v33 = vlaneseq }
 0x16b   :  { %v2733_v50 = vadd.f32 %v2202_v40, %v508_v48  ;;  %v2345_v51 = vpack.i.bf16 %v561_v49, %v560_v46  ;;  %v562_v53 = vmul.f32 %v2729_v47, %v2729_v47  ;;  %v759_v34 = vunpack.c.0.s8 %v758_v32  ;;  %v774_v46 = vld [vmem:[%s3085_s6] sm:$0x1]  ;;  %v2413_v32 = vld [vmem:[%s3081_s2 + $0xd0] sm:$0xff]  }
 0x16c   :  { %v761_v35 = vshrl.u32 %v760_v33, 7  ;;  %v2408_v33 = vld [vmem:[%s3081_s2 + $0x10] sm:$0xff]  }
 0x16d   :  { %2346 = vrot.lane.b32.xlu0 %v2345_v51, %s2471_s14  ;;  %v563_v54 = vmul.f32 %v2733_v50, %v2733_v50 }
 0x16e   :  { %v2809_v37 = vsub.s32 %v759_v34, %v761_v35  ;;  %v2825_v51 = vsub.s32 0, %v761_v35  ;;  %v2410_v34 = vld [vmem:[%s3081_s2 + $0x58] sm:$0xff]   ;;  %v2415_v35 = vld [vmem:[%s3081_s2 + $0x90] sm:$0xff]  }
 0x16f   :  { %v2350_v55 = vpack.i.bf16 %v563_v54, %v562_v53 }
 0x171   :  { %2351 = vrot.lane.b32.xlu1 %v2350_v55, %s2471_s14 }
 0x1df   :  { %v2347_v56 = vpop.permute.xlu0 %2346 }
 0x1e0   :  { %v2349_v57 = vunpack.i.h.bf16 %v2347_v56  ;;  %v2348_v58 = vunpack.i.l.bf16 %v2347_v56 }
 0x1e2   :  { %v581_v59 = vsel %vm86_vm0, %v2725_v45, %v2349_v57  ;;  %v580_v60 = vsel %vm86_vm0, %v2723_v38, %v2348_v58 }
 0x1e3   :  { %v2296_v61 = vpack.c.bf16 %v581_v59, %v580_v60  ;;  %v2352_v62 = vpop.permute.xlu1 %2351 }
 0x1e4   :  { %v2354_v63 = vunpack.i.h.bf16 %v2352_v62  ;;  %v2353_v0 = vunpack.i.l.bf16 %v2352_v62 }
 0x1e5   :  { %2297 = vmatpush3.bf16.msra.mxu1 %v2296_v61 }
 0x1e6   :  { %v583_v1 = vsel %vm86_vm0, %v2733_v50, %v2354_v63  ;;  %v582_v2 = vsel %vm86_vm0, %v2729_v47, %v2353_v0  ;;  %2298 = vmatprep.subr.bf16.mxu1 %v2474_v36 }
 0x1e7   :  { %v2299_v3 = vpack.c.bf16 %v583_v1, %v582_v2 }
 0x1e9   :  { %2300 = vmatpush3.bf16.msra.mxu1 %v2299_v3 }
 0x1ea   :  { %2233 = vmatprep.subr.mxu1 %v2476_v52 }
 0x1ec   :  { %2212 = vmatmul.mubr.msk.f32.vlgmr.msra.gmra.mrb[8].mxu1 %vm584_vm2, %v2477_v4 }
 0x1ed   :  { %2235 = vmatprep.mubr.msk.f32.mxu1 %vm2475_vm1, %v2476_v52  ;;  %2234 = vmatpush3.msk.msra.mxu1 %vm782_vm4, %v2804_v22 }
 0x1ee   :  { %2238 = vmatprep.subr.mxu1 %v2476_v52 }
 0x2bf   :  { %v654_v17 = vpop.f32.mrb[8].mxu1 }
 0x2c0   :  { %v659_v18 = vrot.slane %v654_v17, 7  ;;  %v2213_v19 = vpop.f32.mrb[9].mxu1 }
 0x2c2   :  { %660 = vrot.lane.b32.xlu0 %v659_v18, %s2471_s14 }
 0x334   :  { %v661_v20 = vpop.permute.xlu0 %660 }
 0x335   :  { %v664_v21 = vsel %vm663_vm3, %v654_v17, %v661_v20 }
 0x336   :  { %2231 = vmatmul.mubr.msk.f32.vlgmr.msra.gmra.mrb[12].mxu0 %vm86_vm0, %v664_v21 }
 0x409   :  { %v742_v23 = vpop.f32.mrb[12].mxu0 }
 0x40a   :  { %v746_v24 = vmul.f32 0.001953125, %v742_v23  ;;  %v2232_v25 = vpop.f32.mrb[13].mxu0  ;;  %v2401_v23 = vld [vmem:[%s3081_s2 + $0x40] sm:$0xff]  }
 0x40b   :  { %v2403_v25 = vld [vmem:[%s3081_s2 + $0x48] sm:$0xff]  }
 0x40c   :  { %v747_v26 = vmul.f32 %v746_v24, %v746_v24 }
 0x40e   :  { %v749_v27 = vrot.slane %v747_v26, 7  ;;  %v2405_v26 = vld [vmem:[%s3081_s2 + $0xc0] sm:$0xff]  }
 0x40f   :  { %2139 = vmatprep.subr.bf16.mxu0 %v2405_v26 }
 0x410   :  { %v751_v28 = vsub.f32 %v746_v24, %v749_v27  ;;  %v2407_v27 = vld [vmem:[%s3081_s2 + $0x80] sm:$0xff]  }
 0x411   :  { %2140 = vmatpush3.bf16.msra.mxu0 %v2407_v27 }
 0x412   :  { %v752_v29 = vmax.f32 %v751_v28, 0.0  ;;  %v2409_v28 = vld [vmem:[%s3081_s2 + $0xc8] sm:$0xff]  }
 0x413   :  { %2141 = vmatprep.subr.bf16.mxu0 %v2409_v28 }
 0x414   :  { %v754_v30 = vadd.f32 1e-05, %v752_v29  ;;  %v2404_v29 = vld [vmem:[%s3081_s2 + $0x8] sm:$0xff]  }
 0x415   :  { %2142 = vmatpush3.bf16.msra.mxu0 %v2411_v31 }
 0x416   :  { %2437 = vrsqrt.f32 %v754_v30  ;;  %v2406_v30 = vld [vmem:[%s3081_s2 + $0x50] sm:$0xff]   ;;  %2143 = vmatprep.subr.bf16.mxu0 %v2413_v32 }
 0x419   :  { %2144 = vmatpush3.bf16.msra.mxu0 %v2415_v35 }
 0x420   :  { %v2438_v39 = vpop.eup %2437 }
 0x421   :  { %v763_v40 = vrot.slane %v2438_v39, %v2809_v37  ;;  %v2417_v39 = vld [vmem:[%s3081_s2 + $0xd8] sm:$0xff]  }
 0x422   :  { %2145 = vmatprep.subr.bf16.mxu0 %v2417_v39 }
 0x423   :  { %v764_v41 = vcombine.high %v763_v40, %v763_v40  ;;  %v2412_v40 = vld [vmem:[%s3081_s2 + $0x18] sm:$0xff]  }
 0x425   :  { %v771_v43 = vrot.slane %v764_v41, %v2809_v37  ;;  %v2414_v41 = vld [vmem:[%s3081_s2 + $0x60] sm:$0xff]  }
 0x427   :  { %v773_v44 = vmul.f32 %v771_v43, %v753_v42  ;;  %v2419_v42 = vld [vmem:[%s3081_s2 + $0x98] sm:$0xff]   ;;  %v2416_v43 = vld [vmem:[%s3081_s2 + $0x20] sm:$0xff]  }
 0x428   :  { %2146 = vmatpush3.bf16.msra.mxu0 %v2419_v42 }
 0x429   :  { %v775_v48 = vmul.f32 %v773_v44, %v746_v24  ;;  %2236 = vmatmul.mubr.msk.f32.vlgmr.msra.gmra.mrb[10].mxu1 %vm778_vm5, %v773_v44  ;;  %v2402_v24 = vld [vmem:[%s3081_s2] sm:$0xff]   ;;  %v2418_v44 = vld [vmem:[%s3081_s2 + $0x68] sm:$0xff]  }
 0x42a   :  { %2239 = vmatpush3.msk.msra.mxu1 %vm782_vm4, %v2804_v22  ;;  %2240 = vmatprep.mubr.msk.f32.mxu1 %vm2475_vm1, %v2476_v52 }
 0x42b   :  { %v776_v49 = vsub.f32 %v774_v46, %v775_v48  ;;  %2111 = vmatprep.subr.bf16.mxu1 %v2401_v23  ;;  %v2420_v46 = vld [vmem:[%s3081_s2 + $0x28] sm:$0xff]   ;;  %v2421_v48 = vld [vmem:[%s3081_s2 + $0xe0] sm:$0xff]  }
 0x42c   :  { %2147 = vmatprep.subr.bf16.mxu0 %v2421_v48 }
 0x42d   :  { %2241 = vmatmul.mubr.msk.f32.vlgmr.msra.gmra.mrb[12].mxu1 %vm778_vm5, %v776_v49  ;;  %v2422_v49 = vld [vmem:[%s3081_s2 + $0x70] sm:$0xff]  }
 0x42e   :  { %2112 = vmatpush3.bf16.msra.mxu1 %v2402_v24 }
 0x42f   :  { %2113 = vmatprep.subr.bf16.mxu1 %v2403_v25 }
 0x432   :  { %2114 = vmatpush3.bf16.msra.mxu1 %v2404_v29 }
 0x433   :  { %2115 = vmatprep.subr.bf16.mxu1 %v2406_v30 }
 0x436   :  { %2116 = vmatpush3.bf16.msra.mxu1 %v2408_v33 }
 0x437   :  { %2117 = vmatprep.subr.bf16.mxu1 %v2410_v34 }
 0x43a   :  { %2118 = vmatpush3.bf16.msra.mxu1 %v2412_v40 }
 0x43b   :  { %2119 = vmatprep.subr.bf16.mxu1 %v2414_v41 }
 0x43e   :  { %2120 = vmatpush3.bf16.msra.mxu1 %v2416_v43  ;;  %v2434_v43 = vld [vmem:[%s3081_s2 + $0x108] sm:$0xff]  }
 0x43f   :  { %2121 = vmatprep.subr.bf16.mxu1 %v2418_v44 }
 0x442   :  { %2122 = vmatpush3.bf16.msra.mxu1 %v2420_v46 }
 0x443   :  { %2123 = vmatprep.subr.bf16.mxu1 %v2422_v49 }
 0x4fc   :  { %v852_v53 = vpop.f32.mrb[10].mxu1 }
 0x4fd   :  { %v932_v54 = vrot.slane %v852_v53, %v2825_v51  ;;  %v2237_v55 = vpop.f32.mrb[11].mxu1  ;;  %v2423_v53 = vld [vmem:[%s3081_s2 + $0xa0] sm:$0xff]  }
 0x4fe   :  { %2148 = vmatpush3.bf16.msra.mxu0 %v2423_v53  ;;  %v2425_v55 = vld [vmem:[%s3081_s2 + $0xe8] sm:$0xff]  }
 0x4ff   :  { %v933_v56 = vmul.f32 %v932_v54, %v2723_v38  ;;  %v934_v58 = vmul.f32 %v932_v54, %v2725_v45  ;;  %v935_v59 = vmul.f32 %v932_v54, %v2729_v47  ;;  %v936_v60 = vmul.f32 %v932_v54, %v2733_v50  ;;  %v2424_v54 = vld [vmem:[%s3081_s2 + $0x30] sm:$0xff]   ;;  %2149 = vmatprep.subr.bf16.mxu0 %v2425_v55 }
 0x500   :  { %v925_v57 = vpop.f32.mrb[12].mxu1  ;;  %2124 = vmatpush3.bf16.msra.mxu1 %v2424_v54  ;;  %v2435_v54 = vld [vmem:[%s3081_s2 + $0x110] sm:$0xff]  }
 0x501   :  { %v940_v61 = vrot.slane %v925_v57, %v2825_v51  ;;  %v2242_v62 = vpop.f32.mrb[13].mxu1  ;;  %v2427_v57 = vld [vmem:[%s3081_s2 + $0xa8] sm:$0xff]  }
 0x502   :  { %2150 = vmatpush3.bf16.msra.mxu0 %v2427_v57  ;;  %v2430_v62 = vld [vmem:[%s3081_s2 + $0xb0] sm:$0xff]  }
 0x503   :  { %v941_v63 = vadd.f32 %v940_v61, %v933_v56  ;;  %v942_v0 = vadd.f32 %v940_v61, %v934_v58  ;;  %v943_v1 = vadd.f32 %v940_v61, %v935_v59  ;;  %v944_v2 = vadd.f32 %v940_v61, %v936_v60  ;;  %v2426_v56 = vld [vmem:[%s3081_s2 + $0x78] sm:$0xff]   ;;  %v2429_v60 = vld [vmem:[%s3081_s2 + $0xf0] sm:$0xff]  }
 0x504   :  { %v2428_v58 = vld [vmem:[%s3081_s2 + $0x38] sm:$0xff]   ;;  %2125 = vmatprep.subr.bf16.mxu1 %v2426_v56  ;;  %2151 = vmatprep.subr.bf16.mxu0 %v2429_v60 }
 0x505   :  { %v945_v3 = vmax.f32 %v941_v63, 0.0  ;;  %v946_v5 = vmax.f32 %v942_v0, 0.0  ;;  %v947_v6 = vmax.f32 %v943_v1, 0.0  ;;  %v948_v7 = vmax.f32 %v944_v2, 0.0  ;;  %2126 = vmatpush3.bf16.msra.mxu1 %v2428_v58  ;;  %v2431_v2 = vld [vmem:[%s3081_s2 + $0x100] sm:$0xff]   ;;  %v2436_v58 = vld [vmem:[%s3081_s2 + $0x118] sm:$0xff]  }
 0x506   :  { %2152 = vmatpush3.bf16.msra.mxu0 %v2430_v62  ;;  %2243 = vmatprep.subr.bf16.mxu1 %v2431_v2 }
 0x507   :  { %v949_v8 = vpack.c.bf16 %v946_v5, %v945_v3  ;;  %v950_v38 = vpack.c.bf16 %v948_v7, %v947_v6  ;;  %v2432_v6 = vld [vmem:[%s3081_s2 + $0xf8] sm:$0xff]  }
 0x508   :  { %2153 = vmatprep.subr.bf16.mxu0 %v2432_v6 }
 0x509   :  { %v952_v11 = vshrl.u32 %v949_v8, 16  ;;  %v959_v45 = vshrl.u32 %v950_v38, 16  ;;  %v955_v50 = vshll.u32 %v949_v8, 16  ;;  %v962_v17 = vshll.u32 %v950_v38, 16 }
 0x50b   :  { %v954_v47 = vrot.slane %v952_v11, 7  ;;  %v961_v12 = vrot.slane %v959_v45, 7  ;;  %v2433_v11 = vld [vmem:[%s3081_s2 + $0xb8] sm:$0xff]  }
 0x50c   :  { %2154 = vmatpush3.bf16.msra.mxu0 %v2433_v11 }
 0x50d   :  { %v974_v14 = vsel %vm971_vm7, %v954_v47, 0  ;;  %v957_v15 = vor.u32 %v955_v50, %v954_v47  ;;  %v964_v19 = vor.u32 %v962_v17, %v961_v12  ;;  %v975_v20 = vsel %vm971_vm7, %v961_v12, 0  ;;  %2313 = vmatprep.subr.bf16.mxu0 %v2474_v36 }
 0x50e   :  { %982 = vrot.lane.b32.xlu0 %v974_v14, %s2479_s5 }
 0x50f   :  { %v972_v18 = vsel %vm971_vm7, 0, %v957_v15  ;;  %v973_v21 = vsel %vm971_vm7, 0, %v964_v19 }
 0x510   :  { %980 = vrot.lane.b32.xlu1 %v972_v18, %s2479_s5 }
 0x512   :  { %986 = vrot.lane.b32.xlu0 %v975_v20, %s2479_s5 }
 0x514   :  { %984 = vrot.lane.b32.xlu1 %v973_v21, %s2479_s5 }
 0x580   :  { %v983_v59 = vpop.permute.xlu0 %982 }
 0x581   :  { %v992_v61 = vsel %vm778_vm5, 0, %v983_v59 }
 0x582   :  { %v999_v63 = vsel %vm997_vm8, %v992_v61, 0  ;;  %v981_v0 = vpop.permute.xlu1 %980 }
 0x583   :  { %v990_v1 = vsel %vm778_vm5, 0, %v981_v0  ;;  %v1009_v7 = vshll.u32 %v999_v63, 16  ;;  %v1029_v28 = vrot.slane %v999_v63, 1 }
 0x584   :  { %v998_v3 = vsel %vm997_vm8, %v990_v1, 0  ;;  %v987_v5 = vpop.permute.xlu0 %986 }
 0x585   :  { %v996_v8 = vsel %vm778_vm5, 0, %v987_v5  ;;  %1038 = vrot.lane.b32.xlu1 %v998_v3, %s2470_s24  ;;  %v1005_v38 = vshll.u32 %v998_v3, 16  ;;  %v1003_v12 = vshrl.u32 %v998_v3, 16  ;;  %v1011_v17 = vrot.slane %v1009_v7, 1 }
 0x586   :  { %v1001_v45 = vsel %vm997_vm8, %v996_v8, 0  ;;  %v985_v47 = vpop.permute.xlu1 %984  ;;  %v1028_v25 = vrot.slane %v998_v3, 1 }
 0x587   :  { %v994_v50 = vsel %vm778_vm5, 0, %v985_v47  ;;  %v1007_v14 = vrot.slane %v1005_v38, 1  ;;  %v1019_v18 = vshll.u32 %v1001_v45, 16  ;;  %v1032_v32 = vrot.slane %v1001_v45, 1 }
 0x588   :  { %v1000_v15 = vsel %vm997_vm8, %v994_v50, 0  ;;  %v1030_v30 = vsel %vm1027_vm10, %v1028_v25, %v1029_v28 }
 0x589   :  { %1034 = vrot.lane.b32.xlu1 %v998_v3, %s2469_s23  ;;  %1040 = vrot.lane.b32.xlu0 %v1000_v15, %s2470_s24  ;;  %v1008_v19 = vor.u32 %v1007_v14, %v1003_v12  ;;  %v1015_v20 = vshll.u32 %v1000_v15, 16  ;;  %v1013_v23 = vshrl.u32 %v1000_v15, 16  ;;  %v1021_v26 = vrot.slane %v1019_v18, 1 }
 0x58a   :  { %v1031_v31 = vrot.slane %v1000_v15, 1 }
 0x58b   :  { %v1012_v21 = vsel %vm1002_vm9, %v1008_v19, %v1011_v17  ;;  %v1017_v24 = vrot.slane %v1015_v20, 1 }
 0x58c   :  { %v1033_v33 = vsel %vm1027_vm10, %v1031_v31, %v1032_v32 }
 0x58d   :  { %1036 = vrot.lane.b32.xlu1 %v1000_v15, %s2469_s23  ;;  %1042 = vrot.lane.b32.xlu0 %v1012_v21, %s2471_s14  ;;  %v1018_v27 = vor.u32 %v1017_v24, %v1013_v23 }
 0x58f   :  { %v1022_v29 = vsel %vm1002_vm9, %v1018_v27, %v1021_v26 }
 0x591   :  { %1054 = vrot.lane.b32.xlu0 %v1030_v30, %s2469_s23  ;;  %1044 = vrot.lane.b32.xlu1 %v1022_v29, %s2471_s14 }
 0x595   :  { %1046 = vrot.lane.b32.xlu0 %v1012_v21, %s2472_s15  ;;  %1050 = vrot.lane.b32.xlu1 %v1012_v21, %s2473_s26 }
 0x599   :  { %1056 = vrot.lane.b32.xlu0 %v1033_v33, %s2469_s23  ;;  %1048 = vrot.lane.b32.xlu1 %v1022_v29, %s2472_s15 }
 0x59d   :  { %1052 = vrot.lane.b32.xlu0 %v1022_v29, %s2473_s26  ;;  %1058 = vrot.lane.b32.xlu1 %v1030_v30, %s2470_s24 }
 0x5a1   :  { %1060 = vrot.lane.b32.xlu0 %v1033_v33, %s2470_s24 }
 0x5f7   :  { %v1039_v34 = vpop.permute.xlu1 %1038 }
 0x5fb   :  { %v1041_v35 = vpop.permute.xlu0 %1040  ;;  %v1035_v39 = vpop.permute.xlu1 %1034 }
 0x5fc   :  { %v1063_v44 = vsel %vm86_vm0, %v998_v3, %v1035_v39 }
 0x5ff   :  { %v1043_v40 = vpop.permute.xlu0 %1042  ;;  %v1037_v41 = vpop.permute.xlu1 %1036 }
 0x600   :  { %v1070_v42 = vsel %vm86_vm0, %v1039_v34, %v1043_v40  ;;  %v1066_v59 = vsel %vm86_vm0, %v1000_v15, %v1037_v41 }
 0x601   :  { %1418 = vmatprep.mubr.bf16.mxu1 %v1070_v42 }
 0x602   :  { %1419 = vmatmul.mubr.bf16.vlgmr.msra.gmra.mrb[16].mxu1 %v1063_v44 }
 0x603   :  { %v1055_v46 = vpop.permute.xlu0 %1054  ;;  %v1045_v48 = vpop.permute.xlu1 %1044  ;;  %2244 = vmatpush3.bf16.msra.mxu1 %v2431_v2 }
 0x604   :  { %v1074_v49 = vsel %vm86_vm0, %v1041_v35, %v1045_v48  ;;  %v1086_v53 = vsel %vm86_vm0, %v1030_v30, %v1055_v46  ;;  %2245 = vmatprep.subr.bf16.mxu1 %v2434_v43  ;;  %v2441_v48 = vld [vmem:[%s3079_s0 + $0x1] sm:$0xff] }
 0x605   :  { %1426 = vmatprep.mubr.bf16.mxu1 %v1074_v49  ;;  %1467 = vmatprep.mubr.bf16.mxu0 %v1086_v53  ;;  %v2442_v49 = vld [vmem:[%s3079_s0 + $0x19] sm:$0xff] }
 0x607   :  { %v1047_v55 = vpop.permute.xlu0 %1046  ;;  %v1051_v56 = vpop.permute.xlu1 %1050  ;;  %2246 = vmatpush3.bf16.msra.mxu1 %v2434_v43 }
 0x608   :  { %v1078_v57 = vsel %vm86_vm0, %v1047_v55, %v1051_v56  ;;  %2247 = vmatprep.subr.bf16.mxu1 %v2435_v54 }
 0x609   :  { %1468 = vmatmul.mubr.bf16.vlgmr.msra.gmra.mrb[16].mxu0 %v1078_v57 }
 0x60a   :  { %1427 = vmatmul.mubr.bf16.gmra.mrb[20].mxu1 %v1066_v59 }
 0x60b   :  { %v1057_v60 = vpop.permute.xlu0 %1056  ;;  %v1049_v61 = vpop.permute.xlu1 %1048  ;;  %2248 = vmatpush3.bf16.msra.mxu1 %v2435_v54 }
 0x60c   :  { %v1090_v62 = vsel %vm86_vm0, %v1033_v33, %v1057_v60  ;;  %2249 = vmatprep.subr.bf16.mxu1 %v2436_v58 }
 0x60d   :  { %1475 = vmatprep.mubr.bf16.mxu0 %v1090_v62 }
 0x60f   :  { %v1053_v63 = vpop.permute.xlu0 %1052  ;;  %v1059_v0 = vpop.permute.xlu1 %1058  ;;  %2250 = vmatpush3.bf16.msra.mxu1 %v2436_v58 }
 0x610   :  { %2251 = vmatprep.mubr.msk.bf16.mxu1 %vm86_vm0, %v1059_v0  ;;  %v1082_v1 = vsel %vm86_vm0, %v1049_v61, %v1053_v63  ;;  %2319 = vmatprep.subr.bf16.mxu1 %v2474_v36 }
 0x611   :  { %1476 = vmatmul.mubr.bf16.gmra.mrb[20].mxu0 %v1082_v1 }
 0x612   :  { %2263 = vmatprep.mubr.msk.f32.mxu0 %vm2475_vm1, %v2476_v52 }
 0x613   :  { %v1061_v2 = vpop.permute.xlu0 %1060 }
 0x614   :  { %2252 = vmatmul.mubr.msk.bf16.vlgmr.msra.gmra.mrb[24].mxu1 %vm86_vm0, %v1061_v2 }
 0x615   :  { %2321 = vmatpush3.bf16.msra.mxu1 %v2768_v9  ;;  %2282 = vmatprep.mubr.msk.f32.mxu1 %vm2475_vm1, %v2476_v52 }
 0x616   :  { %2322 = vmatprep.subr.bf16.mxu1 %v2474_v36 }
 0x619   :  { %2324 = vmatpush3.bf16.msra.mxu1 %v2774_v10 }
 0x61a   :  { %2325 = vmatprep.subr.bf16.mxu1 %v2474_v36 }
 0x61d   :  { %2327 = vmatpush3.bf16.msra.mxu1 %v2784_v13 }
 0x61e   :  { %2328 = vmatprep.subr.bf16.mxu1 %v2474_v36 }
 0x621   :  { %2330 = vmatpush3.bf16.msra.mxu1 %v2794_v16 }
 0x6d5   :  { %v2127_v3 = vpop.f32.mrb[16].mxu1 }
 0x6d6   :  { %v2128_v5 = vpop.f32.mrb[17].mxu1 }
 0x6d7   :  { %v2129_v6 = vadd.f32 %v2128_v5, %v2127_v3  ;;  %v2130_v7 = vpop.f32.mrb[18].mxu1 }
 0x6d8   :  { %v2131_v9 = vpop.f32.mrb[19].mxu1 }
 0x6d9   :  { %v2132_v8 = vadd.f32 %v2131_v9, %v2130_v7 }
 0x6dc   :  { %v2155_v38 = vpop.f32.mrb[16].mxu0 }
 0x6dd   :  { %v2133_v11 = vpop.f32.mrb[20].mxu1  ;;  %v2156_v45 = vpop.f32.mrb[17].mxu0 }
 0x6de   :  { %v2157_v47 = vadd.f32 %v2156_v45, %v2155_v38  ;;  %v2134_v50 = vpop.f32.mrb[21].mxu1  ;;  %v2158_v10 = vpop.f32.mrb[18].mxu0 }
 0x6df   :  { %v2135_v12 = vadd.f32 %v2134_v50, %v2133_v11  ;;  %v2136_v14 = vpop.f32.mrb[22].mxu1  ;;  %v2159_v15 = vpop.f32.mrb[19].mxu0 }
 0x6e0   :  { %v2160_v13 = vadd.f32 %v2159_v15, %v2158_v10  ;;  %v2137_v17 = vpop.f32.mrb[23].mxu1  ;;  %v1470_v18 = vadd.f32 %v2157_v47, %v2129_v6  ;;  %v1713_v15 = vld [vmem:[%s3086_s7] sm:$0x1]  ;;  %s2480_s7 = smov [#allocation2]  }
 0x6e1   :  { %v2138_v19 = vadd.f32 %v2137_v17, %v2136_v14 }
 0x6e2   :  { %v1473_v16 = vadd.f32 %v2160_v13, %v2132_v8 }
 0x6e4   :  { %v2161_v20 = vpop.f32.mrb[20].mxu0 }
 0x6e5   :  { %v2162_v21 = vpop.f32.mrb[21].mxu0 }
 0x6e6   :  { %v2163_v23 = vadd.f32 %v2162_v21, %v2161_v20  ;;  %v2164_v24 = vpop.f32.mrb[22].mxu0 }
 0x6e7   :  { %v2165_v25 = vpop.f32.mrb[23].mxu0  ;;  %v2253_v26 = vpop.f32.mrb[24].mxu1 }
 0x6e8   :  { %v2166_v27 = vadd.f32 %v2165_v25, %v2164_v24  ;;  %v1478_v28 = vadd.f32 %v2163_v23, %v2135_v12  ;;  %v1518_v29 = vpop.f32.mrb[25].mxu1 }
 0x6e9   :  { %v2989_v30 = vadd.f32 %v1518_v29, %v1470_v18  ;;  %v2254_v31 = vpop.f32.mrb[26].mxu1  ;;  %v1734_v18 = vld [vmem:[%s3087_s8] sm:$0x1]  ;;  %s1932_s8 = sshll.u32 %s2480_s7, 4  ;;  %s1933_s8 = int_to_ptr.vmem [resolvable:$true] %s1932_s8 }
 0x6ea   :  { %v2991_v32 = vadd.f32 %v2253_v26, %v1478_v28  ;;  %v1481_v33 = vadd.f32 %v2166_v27, %v2138_v19  ;;  %v1521_v34 = vpop.f32.mrb[27].mxu1  ;;  %s2445_s3 = scalar_lea.vmem %s1933_s8, 512  ;;  %p2450_p1 = scmp.lt.s32.totalorder %s1933_s8, %s1933_s8 }
 0x6eb   :  { %v2993_v35 = vadd.f32 %v1521_v34, %v1473_v16  ;;  %v1533_v40 = vmul.f32 %v2989_v30, %v2989_v30  ;;  %p2446_p0 = scmp.ne.s32.totalorder %s1933_s8, %s2445_s3  ;;  %p2451_p2 = scmp.lt.s32.totalorder %s2445_s3, %s2445_s3 }
 0x6ec   :  { %v2995_v39 = vadd.f32 %v2254_v31, %v1481_v33  ;;  %v1535_v42 = vmul.f32 %v2991_v32, %v2991_v32 }
 0x6ed   :  { %v1534_v41 = vmul.f32 %v2993_v35, %v2993_v35  ;;  %p2452_p3 = por %p2451_p2, %p2450_p1 }
 0x6ee   :  { %v1536_v43 = vmul.f32 %v2995_v39, %v2995_v39 }
 0x6ef   :  { %v2355_v44 = vpack.i.bf16 %v1534_v41, %v1533_v40  ;;  %p2453_p4 = pnand %p2452_p3, %p2446_p0 }
 0x6f0   :  { %v2360_v46 = vpack.i.bf16 %v1536_v43, %v1535_v42 }
 0x6f1   :  { %2356 = vrot.lane.b32.xlu1 %v2355_v44, %s2471_s14 }
 0x6f2   :  { %2361 = vrot.lane.b32.xlu0 %v2360_v46, %s2471_s14 }
 0x6f6   :  { %1903 = vrot.lane.b32.xlu0 %v2441_v48, %s2472_s15 }
 0x6fa   :  { %1907 = vrot.lane.b32.xlu0 %v2442_v49, %s2472_s15 }
 0x763   :  { %v2357_v53 = vpop.permute.xlu1 %2356 }
 0x764   :  { %v2359_v54 = vunpack.i.h.bf16 %v2357_v53  ;;  %v2358_v55 = vunpack.i.l.bf16 %v2357_v53  ;;  %v2362_v56 = vpop.permute.xlu0 %2361 }
 0x765   :  { %v2364_v57 = vunpack.i.h.bf16 %v2362_v56  ;;  %v2363_v58 = vunpack.i.l.bf16 %v2362_v56 }
 0x766   :  { %v1554_v59 = vsel %vm86_vm0, %v2993_v35, %v2359_v54  ;;  %v1553_v60 = vsel %vm86_vm0, %v2989_v30, %v2358_v55 }
 0x767   :  { %v2314_v61 = vpack.c.bf16 %v1554_v59, %v1553_v60  ;;  %v1556_v62 = vsel %vm86_vm0, %v2995_v39, %v2364_v57  ;;  %v1555_v63 = vsel %vm86_vm0, %v2991_v32, %v2363_v58 }
 0x768   :  { %v2317_v0 = vpack.c.bf16 %v1556_v62, %v1555_v63  ;;  %v1904_v20 = vpop.permute.xlu0 %1903 }
 0x769   :  { %2315 = vmatpush3.bf16.msra.mxu0 %v2314_v61 }
 0x76a   :  { %2316 = vmatprep.subr.bf16.mxu0 %v2474_v36  ;;  %v2443_v36 = vld [vmem:[%s3079_s0 + $0x9] sm:$0xff] }
 0x76c   :  { %v1908_v31 = vpop.permute.xlu0 %1907 }
 0x76d   :  { %2318 = vmatpush3.bf16.msra.mxu0 %v2317_v0 }
 0x76e   :  { %2285 = vmatprep.subr.mxu0 %v2476_v52 }
 0x770   :  { %2264 = vmatmul.mubr.msk.f32.vlgmr.msra.gmra.mrb[14].mxu0 %vm584_vm2, %v2477_v4  ;;  %v2444_v4 = vld [vmem:[%s3079_s0 + $0x21] sm:$0xff] }
 0x771   :  { %2286 = vmatpush3.msk.msra.mxu0 %vm782_vm4, %v2804_v22  ;;  %2287 = vmatprep.mubr.msk.f32.mxu0 %vm2475_vm1, %v2476_v52 }
 0x772   :  { %2290 = vmatprep.subr.mxu0 %v2476_v52 }
 0x843   :  { %v1623_v1 = vpop.f32.mrb[14].mxu0 }
 0x844   :  { %v1628_v2 = vrot.slane %v1623_v1, 7  ;;  %v2265_v3 = vpop.f32.mrb[15].mxu0 }
 0x846   :  { %1629 = vrot.lane.b32.xlu1 %v1628_v2, %s2471_s14 }
 0x84a   :  { %1905 = vrot.lane.b32.xlu1 %v2443_v36, %s2472_s15 }
 0x84e   :  { %1909 = vrot.lane.b32.xlu1 %v2444_v4, %s2472_s15 }
 0x8b8   :  { %v1630_v5 = vpop.permute.xlu1 %1629 }
 0x8b9   :  { %v1632_v6 = vsel %vm663_vm3, %v1623_v1, %v1630_v5 }
 0x8ba   :  { %2283 = vmatmul.mubr.msk.f32.vlgmr.msra.gmra.mrb[14].mxu1 %vm86_vm0, %v1632_v6 }
 0x98d   :  { %v1702_v7 = vpop.f32.mrb[14].mxu1 }
 0x98e   :  { %v1706_v9 = vmul.f32 0.001953125, %v1702_v7  ;;  %v2284_v8 = vpop.f32.mrb[15].mxu1 }
 0x990   :  { %v1707_v38 = vmul.f32 %v1706_v9, %v1706_v9 }
 0x992   :  { %v1709_v11 = vrot.slane %v1707_v38, 7 }
 0x994   :  { %v1711_v45 = vsub.f32 %v1706_v9, %v1709_v11 }
 0x996   :  { %v1712_v47 = vmax.f32 %v1711_v45, 0.0 }
 0x998   :  { %v1714_v50 = vadd.f32 1e-05, %v1712_v47 }
 0x99a   :  { %2439 = vrsqrt.f32 %v1714_v50 }
 0x9a4   :  { %v2440_v10 = vpop.eup %2439 }
 0x9a5   :  { %v1723_v12 = vrot.slane %v2440_v10, %v2809_v37 }
 0x9a7   :  { %v1724_v14 = vcombine.high %v1723_v12, %v1723_v12 }
 0x9a9   :  { %v1731_v13 = vrot.slane %v1724_v14, %v2809_v37  ;;  %v1906_v37 = vpop.permute.xlu1 %1905 }
 0x9ab   :  { %v1733_v17 = vmul.f32 %v1731_v13, %v1713_v15 }
 0x9ad   :  { %v1735_v19 = vmul.f32 %v1733_v17, %v1706_v9  ;;  %2288 = vmatmul.mubr.msk.f32.vlgmr.msra.gmra.mrb[24].mxu0 %vm778_vm5, %v1733_v17  ;;  %v1910_v33 = vpop.permute.xlu1 %1909 }
 0x9ae   :  { %2291 = vmatpush3.msk.msra.mxu0 %vm782_vm4, %v2804_v22  ;;  %2292 = vmatprep.mubr.msk.f32.mxu0 %vm2475_vm1, %v2476_v52 }
 0x9af   :  { %v1736_v16 = vsub.f32 %v1734_v18, %v1735_v19 }
 0x9b1   :  { %2293 = vmatmul.mubr.msk.f32.vlgmr.msra.gmra.mrb[26].mxu0 %vm778_vm5, %v1736_v16 }
 0xa80   :  { %v1806_v21 = vpop.f32.mrb[24].mxu0 }
 0xa81   :  { %v1886_v23 = vrot.slane %v1806_v21, %v2825_v51  ;;  %v2289_v24 = vpop.f32.mrb[25].mxu0 }
 0xa83   :  { %v1887_v25 = vmul.f32 %v1886_v23, %v2989_v30  ;;  %v1888_v27 = vmul.f32 %v1886_v23, %v2993_v35  ;;  %v1889_v29 = vmul.f32 %v1886_v23, %v2991_v32  ;;  %v1890_v52 = vmul.f32 %v1886_v23, %v2995_v39 }
 0xa84   :  { %v1879_v26 = vpop.f32.mrb[26].mxu0 }
 0xa85   :  { %v1894_v28 = vrot.slane %v1879_v26, %v2825_v51  ;;  %v2294_v22 = vpop.f32.mrb[27].mxu0 }
 0xa87   :  { %v1895_v34 = vadd.f32 %v1894_v28, %v1887_v25  ;;  %v1896_v40 = vadd.f32 %v1894_v28, %v1888_v27  ;;  %v1897_v41 = vadd.f32 %v1894_v28, %v1889_v29  ;;  %v1898_v42 = vadd.f32 %v1894_v28, %v1890_v52 }
 0xa89   :  { %v1915_v43 = vadd.f32 %v1904_v20, %v1895_v34  ;;  %v1916_v30 = vadd.f32 %v1906_v37, %v1896_v40  ;;  %v1917_v44 = vadd.f32 %v1908_v31, %v1897_v41  ;;  %v1918_v46 = vadd.f32 %v1910_v33, %v1898_v42 }
 0xa8b   :  { %v1919_v35 = vmax.f32 %v1915_v43, 0.0  ;;  %v1920_v48 = vmax.f32 %v1916_v30, 0.0  ;;  %v1921_v51 = vmax.f32 %v1917_v44, 0.0  ;;  %v1922_v49 = vmax.f32 %v1918_v46, 0.0 }
 0xa8d   :  { %1923 = vst.msk [vmem:[#allocation2] sm:$0xff] %vm86_vm0, %v1919_v35  ;;  %1924 = vst.msk [vmem:[#allocation2 + $0x8] sm:$0xff] %vm86_vm0, %v1920_v48 }
 0xa8e   :  { %1925 = vst.msk [vmem:[#allocation2 + $0x10] sm:$0xff] %vm86_vm0, %v1921_v51  ;;  %1926 = vst.msk [vmem:[#allocation2 + $0x18] sm:$0xff] %vm86_vm0, %v1922_v49 }
 0xa8f   :  { %2456 = shalt.err (!%p2453_p4)
}
 0xa90   :  { %s2457_s1 = scalar_lea.hbm %s3088_s9, 512 }
 0xa91   :  { %p2458_p5 = scmp.ne.s32.totalorder %s3088_s9, %s2457_s1  ;;  %p2461_p6 = scmp.lt.u32.totalorder %s2457_s1, %s3088_s9 }
 0xa93   :  { %p2463_p7 = pnand %p2461_p6, %p2458_p5 }
 0xa95   :  { %2466 = shalt.err (!%p2463_p7)
}
 0xa96   :  { %s2481_s27 = smov 128   ;;  %s2482_s28 = smov 8  }
 0xa97   :  { %1938 = dma.vmem_to_hbm [thread:$0]  %s1933_s8, 512, %s3088_s9, [#allocation3], %s2481_s27, %s2481_s27, %s2482_s28  }
 0xa98   :  { %2467 = dma.done.wait [#allocation3], 512  }
 0xa99   :  { %2468 = vsyncadd [#allocation3], 4294966784 }
 0xa9a   :  { %1942 = vsyncpa [#allocation3], 1 }

</bundles_post_ra>
